<compile_context>
chip_gen: v7x
topology: tpu7x:2x2x1
jax: 0.10.0
libtpu: 0.0.40
codegen_flags: <defaults>
</compile_context>

<pallas_src>
import math

import jax
import jax.numpy as jnp
import numpy as np
from jax import lax
from jax.experimental import pallas as pl
from jax.experimental.pallas import tpu as pltpu

BN_EPS = 1e-5
LEAKY_SLOPE = 0.01
LANE = 128


def _round_up(v, m):
    return ((v + m - 1) // m) * m


def make_gcn_kernel(*, tile_m, n_pad, n_true, fp, compute_dtype):
    """Kernel for grid = (num_layers, num_row_tiles)."""
    inv_n = 1.0 / float(n_true)

    def kernel(adj_ref, x0_ref, w_ref, gb_ref, o_ref,
               xw_ref, z_ref, x_ref, st_ref):
        li = pl.program_id(0)          # layer index (outer, sequential)
        t = pl.program_id(1)           # node row-tile index (inner, streamed)
        n_layers = pl.num_programs(0)
        n_tiles = pl.num_programs(1)

        # ---- per-layer prologue (first row tile): xw = x @ W, reset BN stats ----
        @pl.when(t == 0)
        def _():
            @pl.when(li == 0)
            def _():
                x_ref[...] = x0_ref[...]
            w = w_ref[0]                                    # (fp, fp) compute dtype
            xw_ref[...] = jnp.dot(
                x_ref[...].astype(compute_dtype), w,
                preferred_element_type=jnp.float32).astype(compute_dtype)
            st_ref[...] = jnp.zeros_like(st_ref)

        # ---- streamed row tile: z = (adj + I) @ xw for this node block ----------
        row0 = pl.multiple_of(t * tile_m, tile_m)
        z = jnp.dot(adj_ref[...], xw_ref[...],
                    preferred_element_type=jnp.float32)
        z = z + xw_ref[pl.ds(row0, tile_m), :].astype(jnp.float32)   # fused "+ I"
        z_ref[pl.ds(row0, tile_m), :] = z

        # Linear bias dropped: a per-column constant cancels under training-mode
        # BatchNorm.  Partial statistics accumulate across tiles (cheap VPU adds
        # overlapped with the next slab's DMA / MXU work).
        s = jnp.sum(z, axis=0, keepdims=True)                        # (1, fp)
        sq = jnp.sum(z * z, axis=0, keepdims=True)                   # (1, fp)
        st_ref[...] = st_ref[...] + jnp.concatenate([s, sq], axis=0)

        # ---- per-layer epilogue (last row tile): BN affine + LeakyReLU ----------
        @pl.when(t == n_tiles - 1)
        def _():
            gb = gb_ref[0]                                  # (2, fp) f32
            gamma = gb[0:1, :]
            beta = gb[1:2, :]
            mean = st_ref[0:1, :] * inv_n
            # TODO(synk): one-pass variance (E[z^2]-mean^2) can cancel when
            # |mean| >> std at very large N; switch to centered per-tile sums then.
            var = st_ref[1:2, :] * inv_n - mean * mean
            scale = gamma * lax.rsqrt(var + BN_EPS)         # EUP rsqrt
            shift = beta - mean * scale
            y = z_ref[...] * scale + shift                  # fused BN affine
            y = jnp.where(y >= 0.0, y, LEAKY_SLOPE * y)     # LeakyReLU(0.01)
            if n_pad > n_true:
                rows = lax.broadcasted_iota(jnp.int32, (n_pad, fp), 0)
                y = jnp.where(rows < n_true, y, 0.0)        # keep padded rows zero
            # TODO(synk): dropout with p > 0 would mask here via
            # pltpu.prng_random_bits; p = 0.0 (module default) is a no-op.
            x_ref[...] = y                                  # next layer's input

            @pl.when(li == n_layers - 1)
            def _():
                o_ref[...] = y

    return kernel


def gcn_forward(x, adj_dense, params, *, compute_dtype=jnp.bfloat16, tile_m=None):
    """Fused multi-layer GCN forward. params: list of (W, b, gamma, beta)."""
    n, fin0 = x.shape
    dims = [fin0] + [w.shape[1] for (w, _, _, _) in params]
    num_layers = len(params)
    fp = _round_up(max(dims + [LANE]), LANE)                # lane-dense feature width

    if tile_m is None:
        # >=256 rows on real workloads (full MXU M utilization); small inputs run
        # as a single tile.  Multiple of 16 keeps bf16 sublane packing aligned.
        tile_m = 256 if n >= 256 else _round_up(n, 16)
    assert tile_m % 16 == 0
    n_pad = _round_up(n, tile_m)
    n_tiles = n_pad // tile_m

    # adj cast to the MXU dtype (0/1 entries are exact in bf16); "+ I" fused in-kernel.
    # TODO(synk): a normalized adjacency (non-0/1 values) should stay f32 here.
    adj_p = jnp.pad(adj_dense, ((0, n_pad - n), (0, n_pad - n))).astype(compute_dtype)
    x_p = jnp.pad(x, ((0, n_pad - n), (0, fp - fin0))).astype(jnp.float32)

    w_stack = jnp.stack([
        jnp.pad(w, ((0, fp - w.shape[0]), (0, fp - w.shape[1])))
        for (w, _, _, _) in params]).astype(compute_dtype)            # (L, fp, fp)
    # gamma/beta merged; padded columns get 0 so padded features stay exactly zero.
    gb_stack = jnp.stack([
        jnp.pad(jnp.stack([g, b], axis=0), ((0, 0), (0, fp - g.shape[0])))
        for (_, _, g, b) in params]).astype(jnp.float32)              # (L, 2, fp)

    cdt = np.dtype(compute_dtype).itemsize
    needed = (2 * tile_m * n_pad * cdt                 # double-buffered adj slabs
              + n_pad * fp * 4                         # x0 (resident)
              + 2 * (fp * fp * cdt + 2 * fp * 4)       # W / gb blocks (x2 buffers)
              + n_pad * fp * (cdt + 4 + 4)             # xw / z / x scratches
              + 2 * fp * 4                             # BN stats
              + n_pad * fp * 4)                        # output block
    vmem_limit = int(min(2 * needed + (8 << 20), 100 << 20))

    flops = num_layers * (2 * n_pad * n_pad * fp + 2 * n_pad * fp * fp)
    bytes_accessed = (num_layers * n_pad * n_pad * cdt
                      + 2 * n_pad * fp * 4
                      + num_layers * (fp * fp * cdt + 2 * fp * 4))
    cost = pl.CostEstimate(flops=int(flops),
                           transcendentals=int(num_layers * fp),
                           bytes_accessed=int(bytes_accessed))

    kernel = make_gcn_kernel(tile_m=tile_m, n_pad=n_pad, n_true=n, fp=fp,
                             compute_dtype=compute_dtype)

    out = pl.pallas_call(
        kernel,
        out_shape=jax.ShapeDtypeStruct((n_pad, fp), jnp.float32),
        grid=(num_layers, n_tiles),
        in_specs=[
            pl.BlockSpec((tile_m, n_pad), lambda li, t: (t, 0)),   # adj row slabs
            pl.BlockSpec((n_pad, fp), lambda li, t: (0, 0)),       # x0 (resident)
            pl.BlockSpec((1, fp, fp), lambda li, t: (li, 0, 0)),   # W for layer li
            pl.BlockSpec((1, 2, fp), lambda li, t: (li, 0, 0)),    # gamma/beta li
        ],
        out_specs=pl.BlockSpec((n_pad, fp), lambda li, t: (0, 0)),
        scratch_shapes=[
            pltpu.VMEM((n_pad, fp), compute_dtype),   # xw = x @ W (MXU operand)
            pltpu.VMEM((n_pad, fp), jnp.float32),     # z  (pre-BN activations)
            pltpu.VMEM((n_pad, fp), jnp.float32),     # x  (current layer input)
            pltpu.VMEM((2, fp), jnp.float32),         # [col sum ; col sum of sq]
        ],
        compiler_params=pltpu.CompilerParams(
            dimension_semantics=("arbitrary", "arbitrary"),
            vmem_limit_bytes=vmem_limit),
        cost_estimate=cost,
    )(adj_p, x_p, w_stack, gb_stack)

    # Strip node/lane padding (plain JAX slice).
    return out[:n, :dims[-1]]


def init_gcn_params(key, in_features, hidden_dims):
    """Deterministic parameter init mirroring GCNLayer.reset_parameters()."""
    dims = [in_features] + list(hidden_dims)
    params = []
    for i in range(len(dims) - 1):
        key, wkey = jax.random.split(key)
        fin, fout = dims[i], dims[i + 1]
        # kaiming_uniform_ (a=0, leaky_relu gain sqrt(2)); PyTorch fan_in for an
        # (in_features, out_features) tensor is size(1) = out_features.
        bound = math.sqrt(6.0 / fout)
        w = jax.random.uniform(wkey, (fin, fout), jnp.float32, -bound, bound)
        b = jnp.zeros((fout,), jnp.float32)          # nn.init.zeros_
        gamma = jnp.ones((fout,), jnp.float32)       # BatchNorm1d weight init
        beta = jnp.zeros((fout,), jnp.float32)       # BatchNorm1d bias init
        params.append((w, b, gamma, beta))
    return params


def gcn_reference(x, adj_dense, params):
    """Pure-JAX reference matching the PyTorch forward (training-mode BN)."""
    n = adj_dense.shape[0]
    adj = adj_dense + jnp.eye(n, dtype=adj_dense.dtype)
    for (w, b, gamma, beta) in params:
        h = adj @ x
        z = h @ w + b[None, :]
        mean = jnp.mean(z, axis=0, keepdims=True)
        var = jnp.mean((z - mean) ** 2, axis=0, keepdims=True)
        z = (z - mean) / jnp.sqrt(var + BN_EPS) * gamma[None, :] + beta[None, :]
        x = jnp.where(z >= 0.0, z, LEAKY_SLOPE * z)
    return x


if __name__ == "__main__":
    key = jax.random.PRNGKey(0)
    n_nodes = 48
    in_features = 8
    hidden_dims = [32, 16]

    kx, kadj, kparams = jax.random.split(key, 3)

    x = jax.random.normal(kx, (n_nodes, in_features), dtype=jnp.float32)

    # Synthetic symmetric binary adjacency (the "sparse" adj, materialized dense).
    a = (jax.random.uniform(kadj, (n_nodes, n_nodes)) < 0.25).astype(jnp.float32)
    adj_dense = jnp.clip(a + a.T, 0.0, 1.0)
    adj_dense = adj_dense * (1.0 - jnp.eye(n_nodes, dtype=jnp.float32))

    params = init_gcn_params(kparams, in_features, hidden_dims)

    ref = jax.block_until_ready(gcn_reference(x, adj_dense, params))

    # f32 MXU path (tight tolerance) — validates the tiled/streamed kernel logic.
    out_f32 = jax.block_until_ready(
        gcn_forward(x, adj_dense, params, compute_dtype=jnp.float32, tile_m=16))
    np.testing.assert_allclose(np.asarray(out_f32), np.asarray(ref),
                               rtol=1e-4, atol=1e-4)

    # Default bf16 MXU operands (v5e/v6e/v7x native) with f32 accum + f32 epilogue.
    out_bf16 = jax.block_until_ready(
        gcn_forward(x, adj_dense, params, compute_dtype=jnp.bfloat16, tile_m=16))
    np.testing.assert_allclose(np.asarray(out_bf16), np.asarray(ref),
                               rtol=5e-2, atol=1e-1)

    assert out_bf16.shape == (n_nodes, hidden_dims[-1])
    print("KERNEL_OK")
</pallas_src>

<mosaic_0001>
module attributes {stable_mosaic.version = 11 : i64} {
  func.func @kernel(%arg0: i32, %arg1: i32, %arg2: memref<16x48xf32, #tpu.memory_space<vmem>>, %arg3: memref<48x128xf32, #tpu.memory_space<vmem>>, %arg4: memref<1x128x128xf32, #tpu.memory_space<vmem>>, %arg5: memref<1x2x128xf32, #tpu.memory_space<vmem>>, %arg6: memref<48x128xf32, #tpu.memory_space<vmem>>, %arg7: memref<48x128xf32, #tpu.memory_space<vmem>>, %arg8: memref<48x128xf32, #tpu.memory_space<vmem>>, %arg9: memref<48x128xf32, #tpu.memory_space<vmem>>, %arg10: memref<2x128xf32, #tpu.memory_space<vmem>>) attributes {dimension_semantics = [#tpu.dimension_semantics<arbitrary>, #tpu.dimension_semantics<arbitrary>], iteration_bounds = array<i64: 2, 3>, scalar_prefetch = 0 : i64, scratch_operands = 4 : i64, tpu.core_type = #tpu.core_type<tc>, window_params = [{transform_indices = @transform_0, window_bounds = array<i64: 16, 48>}, {pipeline_mode = #tpu.pipeline_mode<synchronous>, transform_indices = @transform_1, window_bounds = array<i64: 48, 128>}, {transform_indices = @transform_2, window_bounds = array<i64: 1, 128, 128>}, {transform_indices = @transform_3, window_bounds = array<i64: 1, 2, 128>}, {pipeline_mode = #tpu.pipeline_mode<synchronous>, transform_indices = @transform_4, window_bounds = array<i64: 48, 128>}]} {
    %c0_i32 = arith.constant 0 : i32
    %0 = arith.cmpi eq, %arg1, %c0_i32 : i32
    %1 = arith.extui %0 : i1 to i32
    %c0_i32_0 = arith.constant 0 : i32
    %2 = arith.cmpi ne, %1, %c0_i32_0 : i32
    scf.if %2 {
      %c0_i32_13 = arith.constant 0 : i32
      %25 = arith.cmpi eq, %arg0, %c0_i32_13 : i32
      %26 = arith.extui %25 : i1 to i32
      %c0_i32_14 = arith.constant 0 : i32
      %27 = arith.cmpi ne, %26, %c0_i32_14 : i32
      scf.if %27 {
        %c0_26 = arith.constant 0 : index
        %c0_27 = arith.constant 0 : index
        %35 = vector.load %arg3[%c0_26, %c0_27] : memref<48x128xf32, #tpu.memory_space<vmem>>, vector<48x128xf32>
        %c0_28 = arith.constant 0 : index
        %c0_29 = arith.constant 0 : index
        %36 = vector.load %arg9[%c0_28, %c0_29] : memref<48x128xf32, #tpu.memory_space<vmem>>, vector<48x128xf32>
        tpu.vector_store %arg9[%c0_28, %c0_29], %35 {strides = array<i32>} : memref<48x128xf32, #tpu.memory_space<vmem>>, vector<48x128xf32>,
      } else {
      }
      %c0_15 = arith.constant 0 : index
      %c0_16 = arith.constant 0 : index
      %c0_17 = arith.constant 0 : index
      %28 = vector.load %arg4[%c0_15, %c0_16, %c0_17] : memref<1x128x128xf32, #tpu.memory_space<vmem>>, vector<1x128x128xf32>
      %29 = vector.shape_cast %28 : vector<1x128x128xf32> to vector<128x128xf32>
      %c0_18 = arith.constant 0 : index
      %c0_19 = arith.constant 0 : index
      %30 = vector.load %arg9[%c0_18, %c0_19] : memref<48x128xf32, #tpu.memory_space<vmem>>, vector<48x128xf32>
      %cst_20 = arith.constant dense<0.000000e+00> : vector<48x128xf32>
      %31 = tpu.matmul %30, %29, %cst_20 {dimension_numbers = #tpu.dot_dimension_numbers<[1], [0], [0], [1], [0, 0, 1, 1], [], []>} : vector<48x128xf32>, vector<128x128xf32>, vector<48x128xf32> -> vector<48x128xf32>
      %c0_21 = arith.constant 0 : index
      %c0_22 = arith.constant 0 : index
      %32 = vector.load %arg7[%c0_21, %c0_22] : memref<48x128xf32, #tpu.memory_space<vmem>>, vector<48x128xf32>
      tpu.vector_store %arg7[%c0_21, %c0_22], %31 {strides = array<i32>} : memref<48x128xf32, #tpu.memory_space<vmem>>, vector<48x128xf32>,
      %cst_23 = arith.constant 0.000000e+00 : f32
      %33 = vector.broadcast %cst_23 : f32 to vector<2x128xf32>
      %c0_24 = arith.constant 0 : index
      %c0_25 = arith.constant 0 : index
      %34 = vector.load %arg10[%c0_24, %c0_25] : memref<2x128xf32, #tpu.memory_space<vmem>>, vector<2x128xf32>
      tpu.vector_store %arg10[%c0_24, %c0_25], %33 {strides = array<i32>} : memref<2x128xf32, #tpu.memory_space<vmem>>, vector<2x128xf32>,
    } else {
    }
    %c16_i32 = arith.constant 16 : i32
    %3 = arith.muli %arg1, %c16_i32 : i32
    %4 = tpu.assume_multiple %3, 16 : i32
    %c0 = arith.constant 0 : index
    %c0_1 = arith.constant 0 : index
    %5 = vector.load %arg2[%c0, %c0_1] : memref<16x48xf32, #tpu.memory_space<vmem>>, vector<16x48xf32>
    %c0_2 = arith.constant 0 : index
    %c0_3 = arith.constant 0 : index
    %6 = vector.load %arg7[%c0_2, %c0_3] : memref<48x128xf32, #tpu.memory_space<vmem>>, vector<48x128xf32>
    %cst = arith.constant dense<0.000000e+00> : vector<16x128xf32>
    %7 = tpu.matmul %5, %6, %cst {dimension_numbers = #tpu.dot_dimension_numbers<[1], [0], [0], [1], [0, 0, 1, 1], [], []>} : vector<16x48xf32>, vector<48x128xf32>, vector<16x128xf32> -> vector<16x128xf32>
    %8 = arith.index_cast %4 : i32 to index
    %c0_4 = arith.constant 0 : index
    %9 = vector.load %arg7[%8, %c0_4] : memref<48x128xf32, #tpu.memory_space<vmem>>, vector<16x128xf32>
    %10 = arith.addf %7, %9 : vector<16x128xf32>
    %11 = arith.index_cast %4 : i32 to index
    %c0_5 = arith.constant 0 : index
    %12 = vector.load %arg8[%11, %c0_5] : memref<48x128xf32, #tpu.memory_space<vmem>>, vector<16x128xf32>
    tpu.vector_store %arg8[%11, %c0_5], %10 {strides = array<i32>} : memref<48x128xf32, #tpu.memory_space<vmem>>, vector<16x128xf32>,
    %cst_6 = arith.constant dense<0.000000e+00> : vector<128xf32>
    %13 = vector.multi_reduction <add>, %10, %cst_6 [0] : vector<16x128xf32> to vector<128xf32>
    %14 = vector.shape_cast %13 : vector<128xf32> to vector<1x128xf32>
    %15 = arith.mulf %10, %10 : vector<16x128xf32>
    %cst_7 = arith.constant dense<0.000000e+00> : vector<128xf32>
    %16 = vector.multi_reduction <add>, %15, %cst_7 [0] : vector<16x128xf32> to vector<128xf32>
    %17 = vector.shape_cast %16 : vector<128xf32> to vector<1x128xf32>
    %c0_8 = arith.constant 0 : index
    %c0_9 = arith.constant 0 : index
    %18 = vector.load %arg10[%c0_8, %c0_9] : memref<2x128xf32, #tpu.memory_space<vmem>>, vector<2x128xf32>
    %19 = tpu.concatenate %14, %17 in 0 : vector<1x128xf32>, vector<1x128xf32> -> vector<2x128xf32>
    %20 = arith.addf %18, %19 : vector<2x128xf32>
    %c0_10 = arith.constant 0 : index
    %c0_11 = arith.constant 0 : index
    %21 = vector.load %arg10[%c0_10, %c0_11] : memref<2x128xf32, #tpu.memory_space<vmem>>, vector<2x128xf32>
    tpu.vector_store %arg10[%c0_10, %c0_11], %20 {strides = array<i32>} : memref<2x128xf32, #tpu.memory_space<vmem>>, vector<2x128xf32>,
    %c2_i32 = arith.constant 2 : i32
    %22 = arith.cmpi eq, %arg1, %c2_i32 : i32
    %23 = arith.extui %22 : i1 to i32
    %c0_i32_12 = arith.constant 0 : i32
    %24 = arith.cmpi ne, %23, %c0_i32_12 : i32
    scf.if %24 {
      %c0_13 = arith.constant 0 : index
      %c0_14 = arith.constant 0 : index
      %c0_15 = arith.constant 0 : index
      %25 = vector.load %arg5[%c0_13, %c0_14, %c0_15] : memref<1x2x128xf32, #tpu.memory_space<vmem>>, vector<1x2x128xf32>
      %26 = vector.shape_cast %25 : vector<1x2x128xf32> to vector<2x128xf32>
      %27 = vector.extract_strided_slice %26 {offsets = [0, 0], sizes = [1, 128], strides = [1, 1]} : vector<2x128xf32> to vector<1x128xf32>
      %28 = vector.extract_strided_slice %26 {offsets = [1, 0], sizes = [1, 128], strides = [1, 1]} : vector<2x128xf32> to vector<1x128xf32>
      %c0_16 = arith.constant 0 : index
      %c0_17 = arith.constant 0 : index
      %29 = vector.load %arg10[%c0_16, %c0_17] : memref<2x128xf32, #tpu.memory_space<vmem>>, vector<1x128xf32>
      %cst_18 = arith.constant 0.020833334 : f32
      %30 = vector.broadcast %cst_18 : f32 to vector<1x128xf32>
      %31 = arith.mulf %29, %30 : vector<1x128xf32>
      %c1 = arith.constant 1 : index
      %c0_19 = arith.constant 0 : index
      %32 = vector.load %arg10[%c1, %c0_19] : memref<2x128xf32, #tpu.memory_space<vmem>>, vector<1x128xf32>
      %cst_20 = arith.constant 0.020833334 : f32
      %33 = vector.broadcast %cst_20 : f32 to vector<1x128xf32>
      %34 = arith.mulf %32, %33 : vector<1x128xf32>
      %35 = arith.mulf %31, %31 : vector<1x128xf32>
      %36 = arith.subf %34, %35 : vector<1x128xf32>
      %cst_21 = arith.constant 9.99999974E-6 : f32
      %37 = vector.broadcast %cst_21 : f32 to vector<1x128xf32>
      %38 = arith.addf %36, %37 : vector<1x128xf32>
      %39 = math.rsqrt %38 : vector<1x128xf32>
      %40 = arith.mulf %27, %39 : vector<1x128xf32>
      %41 = arith.mulf %31, %40 : vector<1x128xf32>
      %42 = arith.subf %28, %41 : vector<1x128xf32>
      %c0_22 = arith.constant 0 : index
      %c0_23 = arith.constant 0 : index
      %43 = vector.load %arg8[%c0_22, %c0_23] : memref<48x128xf32, #tpu.memory_space<vmem>>, vector<48x128xf32>
      %44 = vector.broadcast %40 : vector<1x128xf32> to vector<48x128xf32>
      %45 = arith.mulf %43, %44 : vector<48x128xf32>
      %46 = vector.broadcast %42 : vector<1x128xf32> to vector<48x128xf32>
      %47 = arith.addf %45, %46 : vector<48x128xf32>
      %cst_24 = arith.constant 0.000000e+00 : f32
      %48 = vector.broadcast %cst_24 : f32 to vector<48x128xf32>
      %49 = arith.cmpf oge, %47, %48 : vector<48x128xf32>
      %cst_25 = arith.constant 0.00999999977 : f32
      %50 = vector.broadcast %cst_25 : f32 to vector<48x128xf32>
      %51 = arith.mulf %50, %47 : vector<48x128xf32>
      %52 = arith.select %49, %47, %51 : vector<48x128xi1>, vector<48x128xf32>
      %c0_26 = arith.constant 0 : index
      %c0_27 = arith.constant 0 : index
      %53 = vector.load %arg9[%c0_26, %c0_27] : memref<48x128xf32, #tpu.memory_space<vmem>>, vector<48x128xf32>
      tpu.vector_store %arg9[%c0_26, %c0_27], %52 {strides = array<i32>} : memref<48x128xf32, #tpu.memory_space<vmem>>, vector<48x128xf32>,
      %c1_i32 = arith.constant 1 : i32
      %54 = arith.cmpi eq, %arg0, %c1_i32 : i32
      %55 = arith.extui %54 : i1 to i32
      %c0_i32_28 = arith.constant 0 : i32
      %56 = arith.cmpi ne, %55, %c0_i32_28 : i32
      scf.if %56 {
        %c0_29 = arith.constant 0 : index
        %c0_30 = arith.constant 0 : index
        %57 = vector.load %arg6[%c0_29, %c0_30] : memref<48x128xf32, #tpu.memory_space<vmem>>, vector<48x128xf32>
        tpu.vector_store %arg6[%c0_29, %c0_30], %52 {strides = array<i32>} : memref<48x128xf32, #tpu.memory_space<vmem>>, vector<48x128xf32>,
      } else {
      }
    } else {
    }
    return
  }
  func.func @transform_0(%arg0: i32, %arg1: i32) -> (i32, i32) {
    %c0_i32 = arith.constant 0 : i32
    %c0_i32_0 = arith.constant 0 : i32
    return %arg1, %c0_i32 : i32, i32
  }
  func.func @transform_1(%arg0: i32, %arg1: i32) -> (i32, i32) {
    %c0_i32 = arith.constant 0 : i32
    %c0_i32_0 = arith.constant 0 : i32
    %c0_i32_1 = arith.constant 0 : i32
    return %c0_i32, %c0_i32_0 : i32, i32
  }
  func.func @transform_2(%arg0: i32, %arg1: i32) -> (i32, i32, i32) {
    %c0_i32 = arith.constant 0 : i32
    %c0_i32_0 = arith.constant 0 : i32
    %c0_i32_1 = arith.constant 0 : i32
    return %arg0, %c0_i32, %c0_i32_0 : i32, i32, i32
  }
  func.func @transform_3(%arg0: i32, %arg1: i32) -> (i32, i32, i32) {
    %c0_i32 = arith.constant 0 : i32
    %c0_i32_0 = arith.constant 0 : i32
    %c0_i32_1 = arith.constant 0 : i32
    return %arg0, %c0_i32, %c0_i32_0 : i32, i32, i32
  }
  func.func @transform_4(%arg0: i32, %arg1: i32) -> (i32, i32) {
    %c0_i32 = arith.constant 0 : i32
    %c0_i32_0 = arith.constant 0 : i32
    %c0_i32_1 = arith.constant 0 : i32
    return %c0_i32, %c0_i32_0 : i32, i32
  }
}

</mosaic_0001>

<bundles_post_ra>
// kernel: tpu_custom_call.1
= control target key start
LH: loop header
LB: loop body
LE: loop exit
PB: predicated region body
PF: predicated region fallthrough
CT: control target
= control target key end

     0   :  { %s1653_s0 = inlined_call_operand.hbm [shape: f32[48,48], index: 0, kind: input, shape index: {}]   ;;  %s1654_s1 = inlined_call_operand.hbm [shape: f32[48,128], index: 1, kind: input, shape index: {}]   ;;  %s1655_s2 = inlined_call_operand.hbm [shape: f32[2,128,128], index: 2, kind: input, shape index: {}]   ;;  %s1656_s3 = inlined_call_operand.vmem [shape: f32[2,2,128], index: 3, kind: input, shape index: {}]   ;;  %s1657_s4 = inlined_call_operand.hbm [shape: f32[48,128], index: 4, kind: output, shape index: {}]  }
   0x1   :  { %1671 = sst [smem:[#allocation19_spill]] %s1653_s0 }
   0x2   :  { %1672 = sst [smem:[#allocation20_spill]] %s1654_s1 }
   0x3   :  { %9 = vsyncpa [#allocation7], 0 }
   0x4   :  { %11 = vsyncpa [#allocation7 + $0x1], 0 }
   0x5   :  { %12 = vsyncpa [#allocation10], 0 }
   0x6   :  { %13 = vsyncpa [#allocation8], 0  ;;  %s1295_s15 = smov 0   ;;  %s1297_s16 = smov 0  }
   0x7   :  { %s1299_s17 = smov 0   ;;  %s1301_s18 = smov 0  }
   0x8   :  { %s1303_s19 = smov 0   ;;  %s1305_s20 = smov 0  }
   0x9   :  { %s1307_s21 = smov 0   ;;  %s1309_s22 = smov 0  }
   0xa   :  { %s1311_s23 = smov 0   ;;  %s1313_s24 = smov 0  }
   0xb   :  { %s1315_s25 = smov 0  }
   0xc LB: > { %s28_s26 = sadd.s32 1, %s1251_s23  ;;  %s38_s27 = sadd.s32 1, %s1239_s20  ;;  %s1259_s25 = sphi %s1315_s25, %s19_s25   ;;  %s1255_s24 = sphi %s1313_s24, %s1707_s24   ;;  %s1251_s23 = sphi %s1311_s23, %s1706_s23   ;;  %s1247_s22 = sphi %s1309_s22, %s1705_s22   ;;  %s1243_s21 = sphi %s1307_s21, %s1704_s21   ;;  %s1239_s20 = sphi %s1305_s20, %s1703_s20   ;;  %s1235_s19 = sphi %s1303_s19, %s1702_s19   ;;  %s1231_s18 = sphi %s1301_s18, %s1701_s18   ;;  %s1227_s17 = sphi %s1299_s17, %s1700_s17   ;;  %s1223_s16 = sphi %s1297_s16, %s1699_s16   ;;  %s1219_s15 = sphi %s1295_s15, %s1698_s15  }
   0xd   : > { %p1352_p0 = scmp.ge.s32.totalorder %s28_s26, 3  ;;  %p45_p1 = scmp.ne.s32.totalorder %s1239_s20, %s1235_s19 }
   0xe   : > { %p1659_p2 = scmp.eq.s32.totalorder %s1259_s25, 0  ;;  %p1658_p5 = scmp.lt.s32.totalorder %s1259_s25, 6 }
   0xf   : > { %s1673_s28 = scalar_select %p1352_p0, 1, 0 }
  0x10   : > { %s1709_s26 = smov (%p1352_p0, %s28_s26), 0  ;;  %p1365_p3 = por %p1659_p2, %p45_p1 }
  0x11   : > { %1674 = sst [smem:[#allocation17_spill]] %s1709_s26  ;;  %s35_s30 = ssub.s32 %s1251_s23, %s1709_s26 }
  0x12   : > { %p36_p4 = scmp.eq.s32.totalorder %s35_s30, 0  ;;  %s182_s5 = sand.u32 1, %s1259_s25  }
  0x13   : > { %s184_s6 = sand.u32 1, %s1239_s20   ;;  %s770_s9 = sshll.u32 %s1251_s23, 8 }
  0x14   : > { %s1375_s7 = scalar_select %p36_p4, %s1239_s20, %s38_s27  }
  0x15   : > { %s748_s8 = sshll.u32 %s184_s6, 4  ;;  %s1676_s0 = sld [smem:[#allocation19_spill]] }
  0x16   : > { %s186_s13 = scalar_lea.vmem [#allocation6], %s748_s8  ;;  %p1389_p6 = pnand %p1658_p5, %p1365_p3 }
  0x17   : > { %s193_s14 = sshll.u32 %s186_s13, 4  ;;  %s1393_s30 = scalar_lea.sflag [#allocation7], %s182_s5  ;;  %s1383_s14 = int_to_ptr.vmem [resolvable:$true] %s193_s14 }
  0x18   : > { %p1045_p8 = pneg %p1389_p6 }
  0x1b   : > { %s1381_s12 = scalar_lea.hbm %s1676_s0, %s770_s9  ;;  %s1048_s29 = scalar_lea.hbm %s1676_s0, 768 }
  0x1c   : > { %s1043_s6 = scalar_lea.hbm %s1381_s12, 256  ;;  %p1049_p11 = scmp.lt.u32.totalorder %s1381_s12, %s1676_s0 }
  0x1d   : > { %p1044_p7 = scmp.ne.s32.totalorder %s1381_s12, %s1043_s6  ;;  %p1050_p12 = scmp.lt.u32.totalorder %s1048_s29, %s1043_s6 }
  0x1e   : > { %p1052_p1 = scmp.lt.u32.totalorder %s1043_s6, %s1381_s12 }
  0x1f   : > { %p1046_p9 = pnand %p1045_p8, %p1044_p7  ;;  %p1051_p13 = por %p1050_p12, %p1049_p11 }
  0x21   : > { %p1047_p10 = pneg %p1046_p9  ;;  %p1053_p3 = por %p1052_p1, %p1051_p13 }
  0x23   : > { %p1054_p4 = pnand %p1053_p3, %p1047_p10 }
  0x25   : > { %1057 = shalt.err (!%p1054_p4)
}
  0x26   : > { %s1058_s5 = scalar_lea.vmem %s1383_s14, 256  ;;  %s1261_s13 = smov [#allocation6]  }
  0x27   : > { %p1059_p7 = scmp.ne.s32.totalorder %s1383_s14, %s1058_s5  ;;  %s1063_s8 = sshll.u32 %s1261_s13, 4  ;;  %s1064_s8 = int_to_ptr.vmem [resolvable:$false] %s1063_s8 }
  0x28   : > { %s1065_s9 = scalar_lea.vmem %s1064_s8, 512  ;;  %p1066_p2 = scmp.lt.s32.totalorder %s1383_s14, %s1064_s8 }
  0x29   : > { %p1061_p9 = pnand %p1059_p7, %p1045_p8  ;;  %p1067_p11 = scmp.lt.s32.totalorder %s1065_s9, %s1058_s5 }
  0x2b   : > { %p1062_p5 = pneg %p1061_p9  ;;  %p1068_p12 = por %p1067_p11, %p1066_p2 }
  0x2d   : > { %p1069_p13 = pnand %p1068_p12, %p1062_p5 }
  0x2f   : > { %1072 = shalt.err (!%p1069_p13)
}
  0x30   : > { %s1660_s6 = smov 128   ;;  %s1662_s29 = smov 8  }
  0x31   : > { %937 = dma.hbm_to_vmem [thread:$0]  (!%p1389_p6), %s1381_s12, 256, %s1383_s14, %s1393_s30, %s1660_s6, %s1660_s6, %s1662_s29  }
  0x32   : > { %s1425_s10 = sadd.s32 4294967295, %s1259_s25   ;;  %p51_p2 = scmp.ne.s32.totalorder %s1235_s19, %s1231_s18 }
  0x33   : > { %p1665_p5 = scmp.eq.s32.totalorder %s1425_s10, 0  ;;  %p98_p8 = scmp.ne.s32.totalorder %s1223_s16, %s1219_s15 }
  0x34   : > { %p745_p10 = scmp.ge.s32.totalorder %s1259_s25, 1  ;;  %p156_p3 = scmp.lt.s32.totalorder %s1259_s25, 7 }
  0x35   : > { %p1435_p1 = por %p1665_p5, %p51_p2  ;;  %p1442_p6 = por %p98_p8, %p1665_p5 }
  0x36   : > { %p1446_p4 = pnand %p745_p10, %p156_p3  ;;  %s1264_s18 = smov [#allocation9]  }
  0x37   : > { %s1678_s27 = scalar_select %p1435_p1, 1, 0 }
  0x38   : > { %s1679_s12 = scalar_select %p1442_p6, 1, 0 }
  0x39   : > { %s1680_s14 = scalar_select %p1446_p4, 1, 0 }
  0x3a   : > { %s168_s11 = sshll.u32 %s1264_s18, 4  ;;  %p930_p7 = pneg %p1446_p4  ;;  %s169_s11 = int_to_ptr.vmem [resolvable:$true] %s168_s11 }
  0x3b   : > { %s31_s5 = sadd.s32 1, %s1255_s24  ;;  %s1682_s1 = sld [smem:[#allocation20_spill]] }
  0x3c   : > { %p1454_p9 = pnand %p930_p7, %p1665_p5 }
  0x3e   : > { %p1075_p13 = pneg %p1454_p9 }
  0x41   : > { %s1073_s9 = scalar_lea.hbm %s1682_s1, 768 }
  0x42   : > { %p1074_p12 = scmp.ne.s32.totalorder %s1682_s1, %s1073_s9  ;;  %p1080_p10 = scmp.lt.u32.totalorder %s1073_s9, %s1682_s1 }
  0x44   : > { %p1076_p2 = pnand %p1075_p13, %p1074_p12 }
  0x46   : > { %p1077_p8 = pneg %p1076_p2 }
  0x48   : > { %p1082_p3 = pnand %p1080_p10, %p1077_p8 }
  0x4a   : > { %1085 = shalt.err (!%p1082_p3)
}
  0x4b   : > { %s1086_s26 = scalar_lea.vmem %s169_s11, 768  ;;  %p1094_p6 = scmp.lt.s32.totalorder %s169_s11, %s169_s11 }
  0x4c   : > { %p1087_p7 = scmp.ne.s32.totalorder %s169_s11, %s1086_s26  ;;  %p1095_p1 = scmp.lt.s32.totalorder %s1086_s26, %s1086_s26 }
  0x4e   : > { %p1089_p5 = pnand %p1087_p7, %p1075_p13  ;;  %p1096_p4 = por %p1095_p1, %p1094_p6 }
  0x50   : > { %p1090_p11 = pneg %p1089_p5 }
  0x52   : > { %p1097_p0 = pnand %p1096_p4, %p1090_p11 }
  0x54   : > { %1100 = shalt.err (!%p1097_p0)
}
  0x55   : > { %s1683_s6 = smov 8   ;;  %s1684_s29 = smov 128  }
  0x56   : > { %933 = dma.hbm_to_vmem [thread:$0]  (!%p1454_p9), %s1682_s1, 768, %s169_s11, [#allocation10], %s1684_s29, %s1684_s29, %s1683_s6  }
  0x57   : > { %p1685_p0 = scmp.ne.s32.totalorder %s1673_s28, 0  ;;  %s205_s0 = sand.u32 1, %s1227_s17  }
  0x58   : > { %s751_s26 = sshll.u32 %s205_s0, 7  ;;  %p1686_p1 = scmp.eq.s32.totalorder %s1259_s25, 0 }
  0x59   : > { %s1711_s5 = smov (!%p1685_p0, %s31_s5), %s1255_s24  ;;  %p1687_p6 = scmp.ne.s32.totalorder %s1227_s17, %s1223_s16 }
  0x5a   : > { %p33_p5 = scmp.ge.s32.totalorder %s1711_s5, 2  ;;  %s771_s15 = sshll.u32 %s1255_s24, 11 }
  0x5b   : > { %p94_p4 = por %p1687_p6, %p1686_p1  ;;  %s207_s9 = scalar_lea.vmem [#allocation11], %s751_s26 }
  0x5c   : > { %s1713_s5 = smov (%p33_p5, %s1711_s5), 0  ;;  %s214_s18 = sshll.u32 %s207_s9, 4  ;;  %s1506_s18 = int_to_ptr.vmem [resolvable:$true] %s214_s18 }
  0x5d   : > { %1688 = sst [smem:[#allocation18_spill]] %s1713_s5  ;;  %s82_s13 = ssub.s32 %s1255_s24, %s1713_s5 }
  0x5e   : > { %s85_s8 = sadd.s32 1, %s1227_s17  ;;  %p83_p11 = scmp.eq.s32.totalorder %s82_s13, 0 }
  0x5f   : > { %p1689_p12 = scmp.lt.s32.totalorder %s1259_s25, 6  ;;  %s1504_s0 = scalar_lea.hbm %s1655_s2, %s771_s15 }
  0x60   : > { %s1509_s26 = scalar_select %p83_p11, %s1227_s17, %s85_s8  }
  0x61   : > { %p1497_p9 = pnand %p1689_p12, %p94_p4  ;;  %s1101_s9 = scalar_lea.hbm %s1504_s0, 2048 }
  0x62   : > { %p1102_p13 = scmp.ne.s32.totalorder %s1504_s0, %s1101_s9  ;;  %s1106_s15 = scalar_lea.hbm %s1655_s2, 4096 }
  0x63   : > { %p1103_p2 = pneg %p1497_p9  ;;  %p1107_p3 = scmp.lt.u32.totalorder %s1504_s0, %s1655_s2 }
  0x64   : > { %p1108_p7 = scmp.lt.u32.totalorder %s1106_s15, %s1101_s9  ;;  %p1110_p5 = scmp.lt.u32.totalorder %s1101_s9, %s1504_s0 }
  0x65   : > { %p1104_p8 = pnand %p1103_p2, %p1102_p13 }
  0x66   : > { %p1109_p0 = por %p1108_p7, %p1107_p3 }
  0x67   : > { %p1105_p10 = pneg %p1104_p8 }
  0x68   : > { %p1111_p1 = por %p1110_p5, %p1109_p0 }
  0x6a   : > { %p1112_p6 = pnand %p1111_p1, %p1105_p10 }
  0x6c   : > { %1115 = shalt.err (!%p1112_p6)
}
  0x6d   : > { %s1116_s8 = scalar_lea.vmem %s1506_s18, 2048  ;;  %s1265_s1 = smov [#allocation11]  }
  0x6e   : > { %p1117_p4 = scmp.ne.s32.totalorder %s1506_s18, %s1116_s8  ;;  %s1121_s13 = sshll.u32 %s1265_s1, 4  ;;  %s1122_s13 = int_to_ptr.vmem [resolvable:$false] %s1121_s13 }
  0x6f   : > { %s1123_s5 = scalar_lea.vmem %s1122_s13, 4096  ;;  %p1124_p13 = scmp.lt.s32.totalorder %s1506_s18, %s1122_s13 }
  0x70   : > { %p1119_p11 = pnand %p1117_p4, %p1103_p2  ;;  %p1125_p8 = scmp.lt.s32.totalorder %s1123_s5, %s1116_s8 }
  0x72   : > { %p1120_p12 = pneg %p1119_p11  ;;  %p1126_p3 = por %p1125_p8, %p1124_p13 }
  0x74   : > { %p1127_p7 = pnand %p1126_p3, %p1120_p12 }
  0x76   : > { %1130 = shalt.err (!%p1127_p7)
}
  0x77   : > { %940 = dma.hbm_to_vmem [thread:$0]  (!%p1497_p9), %s1504_s0, 2048, %s1506_s18, %s1393_s30, %s1684_s29, %s1684_s29, %s1683_s6  }
  0x78   : > { %p1691_p2 = scmp.ne.s32.totalorder %s1680_s14, 0 }
  0x79   : > { %s235_s9 = sand.u32 (!%p1691_p2), 1, %s1425_s10   ;;  %s237_s15 = sand.u32 (!%p1691_p2), 1, %s1235_s19  }
  0x7a   : > { %233 = sbr.rel (%p1691_p2) target bundleno = 732 (0x2dc), region = 36  ;;  %s1544_s11 = sshll.u32 (!%p1691_p2), %s237_s15, 4 }
  0x7b   : > { %s236_s8 = scalar_lea.sflag (!%p1691_p2), [#allocation7], %s235_s9  ;;  %s239_s28 = scalar_lea.vmem (!%p1691_p2), [#allocation6], %s1544_s11 }
  0x7c   : > { %p1692_p10 = scmp.ne.s32.totalorder (!%p1691_p2), %s1678_s27, 0 }
  0x81   : > { %1202 = dma.done.wait (%p1692_p10), %s236_s8, 256  }
  0x82   : > { %1204 = vsyncadd (%p1692_p10), %s236_s8, 4294967040  ;;  %p1693_p9 = scmp.eq.s32.totalorder %s1425_s10, 0 }
  0x84   : > { %1206 = dma.done.wait (%p1693_p9), [#allocation10], 768   ;;  %p1694_p0 = pmov %p1693_p9 }
  0x85   : > { %s250_s30 = sand.u32 1, %s1223_s16   ;;  %p1695_p5 = scmp.ne.s32.totalorder %s1679_s12, 0 }
  0x86   : > { %1208 = vsyncadd (%p1694_p0), [#allocation10], 4294966528  ;;  %s757_s14 = sshll.u32 %s250_s30, 7 }
  0x87   : > { %s1556_s6 = scalar_lea.vmem [#allocation11], %s757_s14 }
  0x88   : > { %1210 = dma.done.wait (%p1695_p5), %s236_s8, 2048  }
  0x89   : > { %1212 = vsyncadd (%p1695_p5), %s236_s8, 4294965248  ;;  %p282_p1 = scmp.lt.s32.totalorder %s1247_s22, 1  ;;  %p759_p6 = scmp.ne.s32.totalorder %s1243_s21, 0 }
  0x8a   : > { %p760_p4 = scmp.ne.s32.totalorder (!%p759_p6), %s1247_s22, 0 }
  0x8b   : > { %s283_s27 = scalar_select %p282_p1, %s1247_s22, 1 }
  0x8c   : > { %289 = sbr.rel (%p759_p6) target bundleno = 407 (0x197), region = 52 }
  0x8d   : > { %s758_s29 = sshll.u32 %s283_s27, 1 }
  0x8e   : > { %s1567_s1 = scalar_lea.vmem %s1656_s3, %s758_s29 }
  0x93   : > { %293 = sbr.rel (%p760_p4) target bundleno = 154 (0x9a), region = 56  ;;  %v294_v0 = vld [vmem:[#allocation9] sm:$0xff] (!%p760_p4)  ;;  %v295_v1 = vld [vmem:[#allocation9 + $0x8] sm:$0xff] (!%p760_p4)  ;;  %v296_v2 = vld [vmem:[#allocation9 + $0x10] sm:$0xff] (!%p760_p4) }
  0x94   : > { %300 = vst [vmem:[#allocation4] sm:$0xff] (!%p760_p4), %v294_v0  ;;  %301 = vst [vmem:[#allocation4 + $0x8] sm:$0xff] (!%p760_p4), %v295_v1  ;;  %v297_v3 = vld [vmem:[#allocation9 + $0x18] sm:$0xff] (!%p760_p4)  ;;  %v298_v4 = vld [vmem:[#allocation9 + $0x20] sm:$0xff] (!%p760_p4) }
  0x95   : > { %302 = vst [vmem:[#allocation4 + $0x10] sm:$0xff] (!%p760_p4), %v296_v2  ;;  %v299_v5 = vld [vmem:[#allocation9 + $0x28] sm:$0xff] (!%p760_p4)  ;;  %303 = vst [vmem:[#allocation4 + $0x18] sm:$0xff] (!%p760_p4), %v297_v3 }
  0x96   : > { %304 = vst [vmem:[#allocation4 + $0x20] sm:$0xff] (!%p760_p4), %v298_v4  ;;  %305 = vst [vmem:[#allocation4 + $0x28] sm:$0xff] (!%p760_p4), %v299_v5 }
  0x9a PF: > { %v306_v6 = vld [vmem:[%s1556_s6] sm:$0xff]  ;;  %v307_v7 = vld [vmem:[%s1556_s6 + $0x8] sm:$0xff]  ;;  %v308_v8 = vld [vmem:[%s1556_s6 + $0x10] sm:$0xff]  ;;  %v1266_v36 = vmov 0.0  }
  0x9b   : > { %v858_v9 = vpack.c.bf16 %v307_v7, %v306_v6  ;;  %v309_v10 = vld [vmem:[%s1556_s6 + $0x18] sm:$0xff]  ;;  %v310_v12 = vld [vmem:[%s1556_s6 + $0x20] sm:$0xff]  ;;  %v311_v13 = vld [vmem:[%s1556_s6 + $0x28] sm:$0xff]  ;;  %429 = vst [vmem:[#allocation5] sm:$0x3] %v1266_v36 }
  0x9c   : > { %v862_v11 = vpack.c.bf16 %v309_v10, %v308_v8  ;;  %v866_v14 = vpack.c.bf16 %v311_v13, %v310_v12  ;;  %v324_v15 = vld [vmem:[#allocation4 + $0x10] sm:$0xff]  ;;  %v313_v17 = vld [vmem:[%s1556_s6 + $0x38] sm:$0xff]  ;;  %v314_v20 = vld [vmem:[%s1556_s6 + $0x40] sm:$0xff] }
  0x9d   : > { %902 = vmatprep.subr.bf16.mxu1 %v858_v9  ;;  %859 = vmatprep.subr.bf16.mxu0 %v858_v9  ;;  %v312_v16 = vld [vmem:[%s1556_s6 + $0x30] sm:$0xff]  ;;  %v322_v18 = vld [vmem:[#allocation4] sm:$0xff]  ;;  %v315_v21 = vld [vmem:[%s1556_s6 + $0x48] sm:$0xff] }
  0x9e   : > { %910 = vmatpush3.bf16.msra.mxu1 %v858_v9  ;;  %861 = vmatpush3.bf16.msra.mxu0 %v858_v9  ;;  %v870_v19 = vpack.c.bf16 %v313_v17, %v312_v16  ;;  %v874_v22 = vpack.c.bf16 %v315_v21, %v314_v20  ;;  %v316_v23 = vld [vmem:[%s1556_s6 + $0x50] sm:$0xff]  ;;  %v317_v24 = vld [vmem:[%s1556_s6 + $0x58] sm:$0xff]  ;;  %v318_v26 = vld [vmem:[%s1556_s6 + $0x60] sm:$0xff] }
  0x9f   : > { %903 = vmatprep.subr.bf16.mxu1 %v862_v11  ;;  %863 = vmatprep.subr.bf16.mxu0 %v862_v11  ;;  %v878_v25 = vpack.c.bf16 %v317_v24, %v316_v23  ;;  %v319_v27 = vld [vmem:[%s1556_s6 + $0x68] sm:$0xff]  ;;  %v320_v29 = vld [vmem:[%s1556_s6 + $0x70] sm:$0xff]  ;;  %v321_v30 = vld [vmem:[%s1556_s6 + $0x78] sm:$0xff] }
  0xa0   : > { %837 = vmatprep.mubr.f32.mxu1 %v324_v15  ;;  %834 = vmatprep.mubr.f32.mxu0 %v322_v18  ;;  %v882_v28 = vpack.c.bf16 %v319_v27, %v318_v26  ;;  %v886_v31 = vpack.c.bf16 %v321_v30, %v320_v29  ;;  %v325_v32 = vld [vmem:[#allocation4 + $0x18] sm:$0xff]  ;;  %v323_v33 = vld [vmem:[#allocation4 + $0x8] sm:$0xff]  ;;  %v326_v34 = vld [vmem:[#allocation4 + $0x20] sm:$0xff] }
  0xa1   : > { %v327_v35 = vld [vmem:[#allocation4 + $0x28] sm:$0xff] }
  0xa2   : > { %911 = vmatpush3.bf16.msra.mxu1 %v862_v11  ;;  %865 = vmatpush3.bf16.msra.mxu0 %v862_v11 }
  0xa3   : > { %904 = vmatprep.subr.bf16.mxu1 %v866_v14  ;;  %867 = vmatprep.subr.bf16.mxu0 %v866_v14 }
  0xa6   : > { %912 = vmatpush3.bf16.msra.mxu1 %v866_v14  ;;  %869 = vmatpush3.bf16.msra.mxu0 %v866_v14 }
  0xa7   : > { %905 = vmatprep.subr.bf16.mxu1 %v870_v19  ;;  %871 = vmatprep.subr.bf16.mxu0 %v870_v19 }
  0xaa   : > { %913 = vmatpush3.bf16.msra.mxu1 %v870_v19  ;;  %873 = vmatpush3.bf16.msra.mxu0 %v870_v19 }
  0xab   : > { %906 = vmatprep.subr.bf16.mxu1 %v874_v22  ;;  %875 = vmatprep.subr.bf16.mxu0 %v874_v22 }
  0xae   : > { %914 = vmatpush3.bf16.msra.mxu1 %v874_v22  ;;  %877 = vmatpush3.bf16.msra.mxu0 %v874_v22 }
  0xaf   : > { %907 = vmatprep.subr.bf16.mxu1 %v878_v25  ;;  %879 = vmatprep.subr.bf16.mxu0 %v878_v25 }
  0xb2   : > { %915 = vmatpush3.bf16.msra.mxu1 %v878_v25  ;;  %881 = vmatpush3.bf16.msra.mxu0 %v878_v25 }
  0xb3   : > { %908 = vmatprep.subr.bf16.mxu1 %v882_v28  ;;  %883 = vmatprep.subr.bf16.mxu0 %v882_v28 }
  0xb6   : > { %916 = vmatpush3.bf16.msra.mxu1 %v882_v28  ;;  %885 = vmatpush3.bf16.msra.mxu0 %v882_v28 }
  0xb7   : > { %909 = vmatprep.subr.bf16.mxu1 %v886_v31  ;;  %887 = vmatprep.subr.bf16.mxu0 %v886_v31 }
  0xba   : > { %917 = vmatpush3.bf16.msra.mxu1 %v886_v31  ;;  %889 = vmatpush3.bf16.msra.mxu0 %v886_v31 }
  0xbd   : > { %838 = vmatmul.mubr.f32.vlgmr.msra.gmra.mrb[0].mxu1 %v325_v32  ;;  %835 = vmatmul.mubr.f32.vlgmr.msra.gmra.mrb[0].mxu0 %v323_v33 }
  0xbe   : > { %840 = vmatprep.mubr.f32.mxu1 %v326_v34 }
  0xc1   : > { %841 = vmatmul.mubr.f32.gmra.mrb[2].mxu1 %v327_v35 }
 0x190   : > { %v839_v37 = vpop.f32.mrb[0].mxu1  ;;  %v836_v38 = vpop.f32.mrb[0].mxu0 }
 0x191   : > { %426 = vst [vmem:[#allocation2 + $0x18] sm:$0xff] %v839_v37  ;;  %v404_v39 = vpop.f32.mrb[1].mxu1  ;;  %424 = vst [vmem:[#allocation2 + $0x8] sm:$0xff] %v836_v38  ;;  %v394_v40 = vpop.f32.mrb[1].mxu0 }
 0x192   : > { %425 = vst [vmem:[#allocation2 + $0x10] sm:$0xff] %v404_v39  ;;  %423 = vst [vmem:[#allocation2] sm:$0xff] %v394_v40 }
 0x194   : > { %v842_v41 = vpop.f32.mrb[2].mxu1 }
 0x195   : > { %428 = vst [vmem:[#allocation2 + $0x28] sm:$0xff] %v842_v41  ;;  %v414_v42 = vpop.f32.mrb[3].mxu1 }
 0x196   : > { %427 = vst [vmem:[#allocation2 + $0x20] sm:$0xff] %v414_v42 }
 0x197 PF: > { %vm442_vm0 = vcmask 392192   ;;  %v431_v51 = vld [vmem:[%s239_s28] sm:$0xff]  ;;  %v432_v53 = vld [vmem:[%s239_s28 + $0x8] sm:$0xff]  ;;  %s761_s12 = sshll.u32 %s1243_s21, 4  ;;  %vm544_vm1 = vcmask 1040384   ;;  %p764_p11 = scmp.ne.s32.totalorder %s1243_s21, 2 }
 0x198   : > { %v434_v44 = vld [vmem:[#allocation2 + $0x8] sm:$0xff]  ;;  %v436_v47 = vld [vmem:[#allocation2 + $0x18] sm:$0xff]  ;;  %855 = vmatprep.mubr.msk.f32.mxu0 %vm442_vm0, %v431_v51  ;;  %s439_s13 = scalar_lea.vmem [#allocation2], %s761_s12  ;;  %s524_s5 = scalar_lea.vmem [#allocation3], %s761_s12  ;;  %v543_v12 = vld [vmem:[#allocation5] sm:$0x3]  ;;  %v573_v22 = vlaneseq (!%p764_p11) }
 0x199   : > { %v433_v43 = vld [vmem:[#allocation2] sm:$0xff]  ;;  %v435_v45 = vld [vmem:[#allocation2 + $0x10] sm:$0xff]  ;;  %p765_p12 = scmp.ne.s32.totalorder (!%p764_p11), %s1247_s22, 1 }
 0x19a   : > { %v890_v46 = vpack.c.bf16 %v434_v44, %v433_v43  ;;  %v894_v48 = vpack.c.bf16 %v436_v47, %v435_v45  ;;  %v574_v23 = vshrl.u32 (!%p764_p11), %v573_v22, 7  ;;  %v552_v24 = vld [vmem:[%s1567_s1] sm:$0x3] (!%p764_p11) }
 0x19c   : > { %v438_v50 = vld [vmem:[#allocation2 + $0x28] sm:$0xff]  ;;  %891 = vmatprep.subr.bf16.mxu0 %v890_v46  ;;  %v575_v25 = vsub.s32 (!%p764_p11), 0, %v574_v23  ;;  %v585_v35 = vsub.s32 (!%p764_p11), 1, %v574_v23 }
 0x19d   : > { %v437_v49 = vld [vmem:[#allocation2 + $0x20] sm:$0xff]  ;;  %893 = vmatpush3.bf16.msra.mxu0 %v890_v46  ;;  %v441_v54 = vld [vmem:[%s439_s13 + $0x8] sm:$0xff] }
 0x19e   : > { %895 = vmatprep.subr.bf16.mxu0 %v894_v48  ;;  %v898_v52 = vpack.c.bf16 %v438_v50, %v437_v49  ;;  %v440_v55 = vld [vmem:[%s439_s13] sm:$0xff] }
 0x1a1   : > { %897 = vmatpush3.bf16.msra.mxu0 %v894_v48 }
 0x1a2   : > { %899 = vmatprep.subr.bf16.mxu0 %v898_v52 }
 0x1a5   : > { %901 = vmatpush3.bf16.msra.mxu0 %v898_v52 }
 0x1a8   : > { %856 = vmatmul.mubr.msk.f32.vlgmr.msra.gmra.mrb[0].mxu0 %vm442_vm0, %v432_v53 }
 0x27b   : > { %v857_v56 = vpop.f32.mrb[0].mxu0 }
 0x27c   : > { %v521_v57 = vadd.f32 %v857_v56, %v441_v54  ;;  %v515_v58 = vpop.f32.mrb[1].mxu0 }
 0x27d   : > { %v516_v59 = vadd.f32 %v515_v58, %v440_v55 }
 0x27e   : > { %526 = vst [vmem:[%s524_s5 + $0x8] sm:$0xff] %v521_v57  ;;  %v535_v60 = vmul.f32 %v521_v57, %v521_v57 }
 0x27f   : > { %525 = vst [vmem:[%s524_s5] sm:$0xff] %v516_v59  ;;  %v527_v61 = vadd.f32 %v521_v57, %v516_v59  ;;  %v534_v62 = vmul.f32 %v516_v59, %v516_v59 }
 0x281   : > { %v528_v63 = vrot.slane %v527_v61, 4  ;;  %v536_v0 = vadd.f32 %v535_v60, %v534_v62 }
 0x283   : > { %v529_v1 = vadd.f32 %v528_v63, %v527_v61  ;;  %v537_v2 = vrot.slane %v536_v0, 4 }
 0x285   : > { %v530_v3 = vrot.slane %v529_v1, 2  ;;  %v538_v4 = vadd.f32 %v537_v2, %v536_v0 }
 0x286   : > { %v567_v29 = vld [vmem:[#allocation3] sm:$0xff] (!%p764_p11)  ;;  %v568_v31 = vld [vmem:[#allocation3 + $0x8] sm:$0xff] (!%p764_p11)  ;;  %v569_v32 = vld [vmem:[#allocation3 + $0x10] sm:$0xff] (!%p764_p11) }
 0x287   : > { %v531_v5 = vadd.f32 %v530_v3, %v529_v1  ;;  %v539_v6 = vrot.slane %v538_v4, 2  ;;  %v570_v33 = vld [vmem:[#allocation3 + $0x18] sm:$0xff] (!%p764_p11)  ;;  %v571_v36 = vld [vmem:[#allocation3 + $0x20] sm:$0xff] (!%p764_p11)  ;;  %v572_v37 = vld [vmem:[#allocation3 + $0x28] sm:$0xff] (!%p764_p11) }
 0x289   : > { %v532_v7 = vrot.slane %v531_v5, 1  ;;  %v540_v8 = vadd.f32 %v539_v6, %v538_v4 }
 0x28b   : > { %v541_v9 = vrot.slane %v540_v8, 1  ;;  %v533_v10 = vadd.f32 %v532_v7, %v531_v5 }
 0x28c   : > { %551 = sbr.rel (%p764_p11) target bundleno = 706 (0x2c2), region = 60 }
 0x28d   : > { %v542_v11 = vadd.f32 %v541_v9, %v540_v8 }
 0x28f   : > { %v545_v13 = vsel %vm544_vm1, %v533_v10, %v542_v11 }
 0x290   : > { %v546_v14 = vadd.f32 %v545_v13, %v543_v12 }
 0x292   : > { %547 = vst [vmem:[#allocation5] sm:$0x3] %v546_v14 }
 0x299   : > { %v553_v15 = vld [vmem:[#allocation5] sm:$0x1]  ;;  %v555_v16 = vld [vmem:[#allocation5 + $0x1] sm:$0x1] }
 0x29a   : > { %v554_v17 = vmul.f32 0.020833334, %v553_v15  ;;  %v556_v18 = vmul.f32 0.020833334, %v555_v16 }
 0x29c   : > { %v557_v19 = vmul.f32 %v554_v17, %v554_v17 }
 0x29e   : > { %v558_v20 = vsub.f32 %v556_v18, %v557_v19 }
 0x2a0   : > { %v559_v21 = vadd.f32 1e-05, %v558_v20 }
 0x2a2   : > { %1041 = vrsqrt.f32 %v559_v21 }
 0x2ac   : > { %v1042_v26 = vpop.eup %1041 }
 0x2ad   : > { %v561_v27 = vmul.f32 %v1042_v26, %v552_v24 }
 0x2af   : > { %v562_v28 = vmul.f32 %v561_v27, %v554_v17  ;;  %v576_v30 = vrot.slane %v561_v27, %v575_v25 }
 0x2b1   : > { %v564_v34 = vrot.slane %v562_v28, 7  ;;  %v577_v38 = vmul.f32 %v576_v30, %v567_v29  ;;  %v578_v40 = vmul.f32 %v576_v30, %v568_v31  ;;  %v579_v41 = vmul.f32 %v576_v30, %v569_v32 }
 0x2b2   : > { %v580_v42 = vmul.f32 %v576_v30, %v570_v33  ;;  %v581_v43 = vmul.f32 %v576_v30, %v571_v36  ;;  %v582_v44 = vmul.f32 %v576_v30, %v572_v37 }
 0x2b3   : > { %v566_v39 = vsub.f32 %v552_v24, %v564_v34 }
 0x2b5   : > { %v586_v45 = vrot.slane %v566_v39, %v585_v35 }
 0x2b7   : > { %v587_v46 = vadd.f32 %v586_v45, %v577_v38  ;;  %v588_v47 = vadd.f32 %v586_v45, %v578_v40  ;;  %v589_v48 = vadd.f32 %v586_v45, %v579_v41  ;;  %v590_v49 = vadd.f32 %v586_v45, %v580_v42 }
 0x2b8   : > { %v591_v50 = vadd.f32 %v586_v45, %v581_v43  ;;  %v592_v51 = vadd.f32 %v586_v45, %v582_v44 }
 0x2b9   : > { %vm593_vm2 = vcmp.ge.f32.partialorder %v587_v46, 0.0  ;;  %v599_v52 = vmul.f32 0.01, %v587_v46  ;;  %vm594_vm3 = vcmp.ge.f32.partialorder %v588_v47, 0.0  ;;  %v600_v53 = vmul.f32 0.01, %v588_v47 }
 0x2ba   : > { %vm595_vm4 = vcmp.ge.f32.partialorder %v589_v48, 0.0  ;;  %v601_v54 = vmul.f32 0.01, %v589_v48  ;;  %vm596_vm5 = vcmp.ge.f32.partialorder %v590_v49, 0.0  ;;  %v602_v55 = vmul.f32 0.01, %v590_v49 }
 0x2bb   : > { %v605_v56 = vsel %vm593_vm2, %v587_v46, %v599_v52  ;;  %v606_v57 = vsel %vm594_vm3, %v588_v47, %v600_v53  ;;  %vm597_vm6 = vcmp.ge.f32.partialorder %v591_v50, 0.0  ;;  %v603_v58 = vmul.f32 0.01, %v591_v50  ;;  %620 = sbr.rel (%p765_p12) target bundleno = 706 (0x2c2), region = 64 }
 0x2bc   : > { %611 = vst [vmem:[#allocation4] sm:$0xff] %v605_v56  ;;  %612 = vst [vmem:[#allocation4 + $0x8] sm:$0xff] %v606_v57  ;;  %v607_v59 = vsel %vm595_vm4, %v589_v48, %v601_v54  ;;  %v608_v60 = vsel %vm596_vm5, %v590_v49, %v602_v55  ;;  %vm598_vm7 = vcmp.ge.f32.partialorder %v592_v51, 0.0  ;;  %v604_v61 = vmul.f32 0.01, %v592_v51 }
 0x2bd   : > { %613 = vst [vmem:[#allocation4 + $0x10] sm:$0xff] %v607_v59  ;;  %614 = vst [vmem:[#allocation4 + $0x18] sm:$0xff] %v608_v60  ;;  %v609_v62 = vsel %vm597_vm6, %v591_v50, %v603_v58 }
 0x2be   : > { %615 = vst [vmem:[#allocation4 + $0x20] sm:$0xff] %v609_v62  ;;  %v610_v63 = vsel %vm598_vm7, %v592_v51, %v604_v61  ;;  %621 = vst [vmem:[#allocation12] sm:$0xff] (!%p765_p12), %v605_v56 }
 0x2bf   : > { %616 = vst [vmem:[#allocation4 + $0x28] sm:$0xff] %v610_v63  ;;  %622 = vst [vmem:[#allocation12 + $0x8] sm:$0xff] (!%p765_p12), %v606_v57 }
 0x2c0   : > { %623 = vst [vmem:[#allocation12 + $0x10] sm:$0xff] (!%p765_p12), %v607_v59  ;;  %624 = vst [vmem:[#allocation12 + $0x18] sm:$0xff] (!%p765_p12), %v608_v60 }
 0x2c1   : > { %625 = vst [vmem:[#allocation12 + $0x20] sm:$0xff] (!%p765_p12), %v609_v62  ;;  %626 = vst [vmem:[#allocation12 + $0x28] sm:$0xff] (!%p765_p12), %v610_v63 }
 0x2c2 PF: > { %p944_p13 = scmp.eq.s32.totalorder %s1425_s10, 5  ;;  %s1267_s21 = smov [#allocation12]  }
 0x2c3   : > { %s633_s9 = sshll.u32 %s1267_s21, 4  ;;  %s634_s9 = int_to_ptr.vmem [resolvable:$true] %s633_s9 }
 0x2c4   : > { %s1131_s15 = scalar_lea.vmem %s634_s9, 768  ;;  %p1138_p2 = scmp.lt.s32.totalorder %s634_s9, %s634_s9 }
 0x2c5   : > { %p1132_p8 = scmp.ne.s32.totalorder %s634_s9, %s1131_s15  ;;  %p1139_p10 = scmp.lt.s32.totalorder %s1131_s15, %s1131_s15 }
 0x2c7   : > { %p1133_p3 = pnand %p1132_p8, %p944_p13  ;;  %p1140_p9 = por %p1139_p10, %p1138_p2 }
 0x2c9   : > { %p1134_p7 = pneg %p1133_p3 }
 0x2cb   : > { %p1141_p0 = pnand %p1140_p9, %p1134_p7 }
 0x2cd   : > { %1144 = shalt.err (!%p1141_p0)
}
 0x2ce   : > { %s1145_s8 = scalar_lea.hbm %s1657_s4, 768 }
 0x2cf   : > { %p1146_p5 = scmp.ne.s32.totalorder %s1657_s4, %s1145_s8  ;;  %p1151_p4 = scmp.lt.u32.totalorder %s1145_s8, %s1657_s4 }
 0x2d1   : > { %p1147_p1 = pnand %p1146_p5, %p944_p13 }
 0x2d3   : > { %p1148_p6 = pneg %p1147_p1 }
 0x2d5   : > { %p1153_p11 = pnand %p1151_p4, %p1148_p6 }
 0x2d7   : > { %1156 = shalt.err (!%p1153_p11)
}
 0x2d8   : > { %s1268_s27 = smov 128   ;;  %s1269_s29 = smov 8  }
 0x2d9   : > { %927 = dma.vmem_to_hbm [thread:$0]  (%p944_p13), %s634_s9, 768, %s1657_s4, [#allocation8], %s1268_s27, %s1268_s27, %s1269_s29  }
 0x2da   : > { %1214 = dma.done.wait (%p944_p13), [#allocation8], 768  }
 0x2db   : > { %1216 = vsyncadd (%p944_p13), [#allocation8], 4294966528 }
 0x2dc PF: > { %s19_s25 = sadd.s32 1, %s1259_s25   ;;  %s1696_s1 = sld [smem:[#allocation17_spill]] }
 0x2dd   : > { %p16_p12 = scmp.ge.s32.totalorder %s19_s25, 8   ;;  %s1697_s12 = sld [smem:[#allocation18_spill]] }
 0x2de   : > { %s1698_s15 = smov %s1223_s16  ;;  %s1699_s16 = smov %s1227_s17 }
 0x2df   : > { %s1700_s17 = smov %s1509_s26  ;;  %s1701_s18 = smov %s1235_s19 }
 0x2e0   : > { %s1702_s19 = smov %s1239_s20  ;;  %s1703_s20 = smov %s1375_s7 }
 0x2e1   : > { %s1704_s21 = smov %s1251_s23  ;;  %s1705_s22 = smov %s1255_s24 }
 0x2e2   : > { %s1706_s23 = smov %s1696_s1  ;;  %18 = sbr.rel (!%p16_p12) target bundleno = 12 (0xc), region = 109 }
 0x2e3   : > { %s1707_s24 = smov %s1697_s12 }
 0x2e9   :  { %649 = vsyncpa [#allocation7], 1 }
 0x2ea   :  { %651 = vsyncpa [#allocation7 + $0x1], 1 }
 0x2eb   :  { %652 = vsyncpa [#allocation10], 1 }
 0x2ec   :  { %653 = vsyncpa [#allocation8], 1 }
 0x2ed   :  { %655 = vsyncpa [#allocation8 + $0x1], 1 }

</bundles_post_ra>
